<compile_context>
chip_gen: v7x
topology: tpu7x:2x2x1
jax: 0.10.0
libtpu: 0.0.40
codegen_flags: <defaults>
</compile_context>

<pallas_src>
import jax
import jax.numpy as jnp
from jax.experimental import pallas as pl
from jax.experimental.pallas import tpu as pltpu

IN_FEATURES = 561
HIDDEN = 256
OUT_FEATURES = 6

K_PAD = 640      # 561 -> next multiple of 128
N_OUT_PAD = 128  # 6   -> one full lane group


def _round_up(n, m):
    return ((n + m - 1) // m) * m


def mlp_kernel(x_ref, w1_ref, b1_ref, w2_ref, b2_ref, w3_ref, b3_ref, o_ref):
    # Layer 1: Linear(561 -> 256) + ReLU.  bf16 x bf16 -> f32 accumulate on MXU.
    h1 = jnp.dot(x_ref[...], w1_ref[...], preferred_element_type=jnp.float32)
    h1 = jnp.maximum(h1 + b1_ref[...], 0.0)

    # Dropout(0.2): identity in eval mode (no scaling, no masking).

    # Layer 2: Linear(256 -> 256) + ReLU.
    h2 = jnp.dot(h1.astype(jnp.bfloat16), w2_ref[...],
                 preferred_element_type=jnp.float32)
    h2 = jnp.maximum(h2 + b2_ref[...], 0.0)

    # Layer 3: Linear(256 -> 6), computed lane-dense as 256 -> 128 (zero-padded).
    out = jnp.dot(h2.astype(jnp.bfloat16), w3_ref[...],
                  preferred_element_type=jnp.float32)
    o_ref[...] = out + b3_ref[...]


def prepare_params(params):
    """One-time: pad + cast weights for the kernel.

    Weights stored [in, out] in bf16; layer-1 K padded to 640, layer-3 output
    padded to 128 lanes.  Biases stay f32 (layer-3 bias padded).
    """
    w1 = jnp.zeros((K_PAD, HIDDEN), jnp.bfloat16)
    w1 = w1.at[:IN_FEATURES, :].set(params["w1"].astype(jnp.bfloat16))
    b1 = params["b1"].astype(jnp.float32)

    w2 = params["w2"].astype(jnp.bfloat16)
    b2 = params["b2"].astype(jnp.float32)

    w3 = jnp.zeros((HIDDEN, N_OUT_PAD), jnp.bfloat16)
    w3 = w3.at[:, :OUT_FEATURES].set(params["w3"].astype(jnp.bfloat16))
    b3 = jnp.zeros((1, N_OUT_PAD), jnp.float32)
    b3 = b3.at[:, :OUT_FEATURES].set(params["b3"].astype(jnp.float32))

    return {"w1": w1, "b1": b1, "w2": w2, "b2": b2, "w3": w3, "b3": b3}


def net_forward(x, kparams, *, tm_max=1024):
    """x: [B, 561] float32. kparams: output of prepare_params. Returns [B, 6] f32."""
    B = x.shape[0]

    # Tile size: largest MXU/VMEM-friendly tile for big batches, otherwise
    # round the (small) batch up to a sublane multiple and run one grid step.
    TM = tm_max if B >= tm_max else _round_up(max(B, 8), 8)
    B_pad = _round_up(B, TM)
    grid = (B_pad // TM,)

    # Pad batch + feature dims and cast activations to bf16 (halves x DMA).
    x_p = jnp.zeros((B_pad, K_PAD), jnp.bfloat16)
    x_p = x_p.at[:B, :IN_FEATURES].set(x.astype(jnp.bfloat16))

    w1, b1, w2, b2, w3, b3 = (
        kparams["w1"], kparams["b1"], kparams["w2"],
        kparams["b2"], kparams["w3"], kparams["b3"],
    )

    # Weights/biases: constant index_map -> resident in VMEM across grid steps.
    const2 = lambda shape: pl.BlockSpec(shape, lambda i: (0, 0))

    bytes_accessed = (
        x_p.size * 2
        + w1.size * 2 + w2.size * 2 + w3.size * 2
        + b1.size * 4 + b2.size * 4 + b3.size * 4
        + B_pad * N_OUT_PAD * 4
    )
    flops = 2 * B_pad * (K_PAD * HIDDEN + HIDDEN * HIDDEN + HIDDEN * N_OUT_PAD)

    out_padded = pl.pallas_call(
        mlp_kernel,
        out_shape=jax.ShapeDtypeStruct((B_pad, N_OUT_PAD), jnp.float32),
        grid=grid,
        in_specs=[
            pl.BlockSpec((TM, K_PAD), lambda i: (i, 0)),      # x tile (pipelined)
            const2((K_PAD, HIDDEN)),                          # w1
            const2((1, HIDDEN)),                              # b1
            const2((HIDDEN, HIDDEN)),                         # w2
            const2((1, HIDDEN)),                              # b2
            const2((HIDDEN, N_OUT_PAD)),                      # w3
            const2((1, N_OUT_PAD)),                           # b3
        ],
        out_specs=pl.BlockSpec((TM, N_OUT_PAD), lambda i: (i, 0)),
        compiler_params=pltpu.CompilerParams(
            dimension_semantics=("parallel",),
        ),
        cost_estimate=pl.CostEstimate(
            flops=flops, transcendentals=0, bytes_accessed=bytes_accessed),
    )(x_p, w1, b1, w2, b2, w3, b3)

    return out_padded[:B, :OUT_FEATURES]


def init_params(key):
    """Deterministic synthetic parameters matching the PyTorch module shapes."""
    k1, k2, k3, k4, k5, k6 = jax.random.split(key, 6)

    # PyTorch Linear default init is U(-1/sqrt(fan_in), 1/sqrt(fan_in)); mimic scale.
    def lin(kw, kb, fan_in, fan_out):
        bound = 1.0 / jnp.sqrt(fan_in)
        w = jax.random.uniform(kw, (fan_in, fan_out), jnp.float32, -bound, bound)
        b = jax.random.uniform(kb, (1, fan_out), jnp.float32, -bound, bound)
        return w, b

    w1, b1 = lin(k1, k2, IN_FEATURES, HIDDEN)
    w2, b2 = lin(k3, k4, HIDDEN, HIDDEN)
    w3, b3 = lin(k5, k6, HIDDEN, OUT_FEATURES)
    return {"w1": w1, "b1": b1, "w2": w2, "b2": b2, "w3": w3, "b3": b3}


if __name__ == "__main__":
    key = jax.random.PRNGKey(0)
    kx, kp = jax.random.split(key)

    B = 8  # small batch for the self-test
    x = jax.random.normal(kx, (B, IN_FEATURES), dtype=jnp.float32)
    params = init_params(kp)
    kparams = prepare_params(params)

    y = net_forward(x, kparams)
    y = jax.block_until_ready(y)
    assert y.shape == (B, OUT_FEATURES)

    # Reference 1: same bf16-quantized weights/activations in plain JAX (tight tol).
    xb = x.astype(jnp.bfloat16)
    h = jnp.maximum(
        jnp.dot(xb, params["w1"].astype(jnp.bfloat16),
                preferred_element_type=jnp.float32) + params["b1"], 0.0)
    h = jnp.maximum(
        jnp.dot(h.astype(jnp.bfloat16), params["w2"].astype(jnp.bfloat16),
                preferred_element_type=jnp.float32) + params["b2"], 0.0)
    ref_bf16 = jnp.dot(h.astype(jnp.bfloat16), params["w3"].astype(jnp.bfloat16),
                       preferred_element_type=jnp.float32) + params["b3"]
    assert jnp.allclose(y, ref_bf16, atol=1e-2, rtol=1e-2)

    # Reference 2: full-f32 PyTorch-equivalent forward (loose tol, bf16 quantization).
    ref = jnp.maximum(x @ params["w1"] + params["b1"], 0.0)
    ref = jnp.maximum(ref @ params["w2"] + params["b2"], 0.0)
    ref = ref @ params["w3"] + params["b3"]
    assert jnp.allclose(y, ref, atol=5e-2, rtol=5e-2)

    print("KERNEL_OK")
</pallas_src>

<mosaic_0001>
module attributes {stable_mosaic.version = 11 : i64} {
  func.func @mlp_kernel(%arg0: i32, %arg1: memref<8x640xbf16, #tpu.memory_space<vmem>>, %arg2: memref<640x256xbf16, #tpu.memory_space<vmem>>, %arg3: memref<1x256xf32, #tpu.memory_space<vmem>>, %arg4: memref<256x256xbf16, #tpu.memory_space<vmem>>, %arg5: memref<1x256xf32, #tpu.memory_space<vmem>>, %arg6: memref<256x128xbf16, #tpu.memory_space<vmem>>, %arg7: memref<1x128xf32, #tpu.memory_space<vmem>>, %arg8: memref<8x128xf32, #tpu.memory_space<vmem>>) attributes {dimension_semantics = [#tpu.dimension_semantics<parallel>], iteration_bounds = array<i64: 1>, scalar_prefetch = 0 : i64, scratch_operands = 0 : i64, tpu.core_type = #tpu.core_type<tc>, window_params = [{transform_indices = @transform_0, window_bounds = array<i64: 8, 640>}, {pipeline_mode = #tpu.pipeline_mode<synchronous>, transform_indices = @transform_1, window_bounds = array<i64: 640, 256>}, {pipeline_mode = #tpu.pipeline_mode<synchronous>, transform_indices = @transform_2, window_bounds = array<i64: 1, 256>}, {pipeline_mode = #tpu.pipeline_mode<synchronous>, transform_indices = @transform_3, window_bounds = array<i64: 256, 256>}, {pipeline_mode = #tpu.pipeline_mode<synchronous>, transform_indices = @transform_4, window_bounds = array<i64: 1, 256>}, {pipeline_mode = #tpu.pipeline_mode<synchronous>, transform_indices = @transform_5, window_bounds = array<i64: 256, 128>}, {pipeline_mode = #tpu.pipeline_mode<synchronous>, transform_indices = @transform_6, window_bounds = array<i64: 1, 128>}, {transform_indices = @transform_7, window_bounds = array<i64: 8, 128>}]} {
    %c0 = arith.constant 0 : index
    %c0_0 = arith.constant 0 : index
    %0 = vector.load %arg1[%c0, %c0_0] : memref<8x640xbf16, #tpu.memory_space<vmem>>, vector<8x640xbf16>
    %c0_1 = arith.constant 0 : index
    %c0_2 = arith.constant 0 : index
    %1 = vector.load %arg2[%c0_1, %c0_2] : memref<640x256xbf16, #tpu.memory_space<vmem>>, vector<640x256xbf16>
    %cst = arith.constant dense<0.000000e+00> : vector<8x256xf32>
    %2 = tpu.matmul %0, %1, %cst {dimension_numbers = #tpu.dot_dimension_numbers<[1], [0], [0], [1], [0, 0, 1, 1], [], []>} : vector<8x640xbf16>, vector<640x256xbf16>, vector<8x256xf32> -> vector<8x256xf32>
    %c0_3 = arith.constant 0 : index
    %c0_4 = arith.constant 0 : index
    %3 = vector.load %arg3[%c0_3, %c0_4] : memref<1x256xf32, #tpu.memory_space<vmem>>, vector<1x256xf32>
    %4 = vector.broadcast %3 : vector<1x256xf32> to vector<8x256xf32>
    %5 = arith.addf %2, %4 : vector<8x256xf32>
    %cst_5 = arith.constant 0.000000e+00 : f32
    %6 = vector.broadcast %cst_5 : f32 to vector<8x256xf32>
    %7 = arith.maximumf %5, %6 : vector<8x256xf32>
    %8 = arith.truncf %7 : vector<8x256xf32> to vector<8x256xbf16>
    %c0_6 = arith.constant 0 : index
    %c0_7 = arith.constant 0 : index
    %9 = vector.load %arg4[%c0_6, %c0_7] : memref<256x256xbf16, #tpu.memory_space<vmem>>, vector<256x256xbf16>
    %cst_8 = arith.constant dense<0.000000e+00> : vector<8x256xf32>
    %10 = tpu.matmul %8, %9, %cst_8 {dimension_numbers = #tpu.dot_dimension_numbers<[1], [0], [0], [1], [0, 0, 1, 1], [], []>} : vector<8x256xbf16>, vector<256x256xbf16>, vector<8x256xf32> -> vector<8x256xf32>
    %c0_9 = arith.constant 0 : index
    %c0_10 = arith.constant 0 : index
    %11 = vector.load %arg5[%c0_9, %c0_10] : memref<1x256xf32, #tpu.memory_space<vmem>>, vector<1x256xf32>
    %12 = vector.broadcast %11 : vector<1x256xf32> to vector<8x256xf32>
    %13 = arith.addf %10, %12 : vector<8x256xf32>
    %cst_11 = arith.constant 0.000000e+00 : f32
    %14 = vector.broadcast %cst_11 : f32 to vector<8x256xf32>
    %15 = arith.maximumf %13, %14 : vector<8x256xf32>
    %16 = arith.truncf %15 : vector<8x256xf32> to vector<8x256xbf16>
    %c0_12 = arith.constant 0 : index
    %c0_13 = arith.constant 0 : index
    %17 = vector.load %arg6[%c0_12, %c0_13] : memref<256x128xbf16, #tpu.memory_space<vmem>>, vector<256x128xbf16>
    %cst_14 = arith.constant dense<0.000000e+00> : vector<8x128xf32>
    %18 = tpu.matmul %16, %17, %cst_14 {dimension_numbers = #tpu.dot_dimension_numbers<[1], [0], [0], [1], [0, 0, 1, 1], [], []>} : vector<8x256xbf16>, vector<256x128xbf16>, vector<8x128xf32> -> vector<8x128xf32>
    %c0_15 = arith.constant 0 : index
    %c0_16 = arith.constant 0 : index
    %19 = vector.load %arg7[%c0_15, %c0_16] : memref<1x128xf32, #tpu.memory_space<vmem>>, vector<1x128xf32>
    %20 = vector.broadcast %19 : vector<1x128xf32> to vector<8x128xf32>
    %21 = arith.addf %18, %20 : vector<8x128xf32>
    %c0_17 = arith.constant 0 : index
    %c0_18 = arith.constant 0 : index
    %22 = vector.load %arg8[%c0_17, %c0_18] : memref<8x128xf32, #tpu.memory_space<vmem>>, vector<8x128xf32>
    tpu.vector_store %arg8[%c0_17, %c0_18], %21 {strides = array<i32>} : memref<8x128xf32, #tpu.memory_space<vmem>>, vector<8x128xf32>,
    return
  }
  func.func @transform_0(%arg0: i32) -> (i32, i32) {
    %c0_i32 = arith.constant 0 : i32
    %c0_i32_0 = arith.constant 0 : i32
    return %arg0, %c0_i32 : i32, i32
  }
  func.func @transform_1(%arg0: i32) -> (i32, i32) {
    %c0_i32 = arith.constant 0 : i32
    %c0_i32_0 = arith.constant 0 : i32
    %c0_i32_1 = arith.constant 0 : i32
    return %c0_i32, %c0_i32_0 : i32, i32
  }
  func.func @transform_2(%arg0: i32) -> (i32, i32) {
    %c0_i32 = arith.constant 0 : i32
    %c0_i32_0 = arith.constant 0 : i32
    %c0_i32_1 = arith.constant 0 : i32
    return %c0_i32, %c0_i32_0 : i32, i32
  }
  func.func @transform_3(%arg0: i32) -> (i32, i32) {
    %c0_i32 = arith.constant 0 : i32
    %c0_i32_0 = arith.constant 0 : i32
    %c0_i32_1 = arith.constant 0 : i32
    return %c0_i32, %c0_i32_0 : i32, i32
  }
  func.func @transform_4(%arg0: i32) -> (i32, i32) {
    %c0_i32 = arith.constant 0 : i32
    %c0_i32_0 = arith.constant 0 : i32
    %c0_i32_1 = arith.constant 0 : i32
    return %c0_i32, %c0_i32_0 : i32, i32
  }
  func.func @transform_5(%arg0: i32) -> (i32, i32) {
    %c0_i32 = arith.constant 0 : i32
    %c0_i32_0 = arith.constant 0 : i32
    %c0_i32_1 = arith.constant 0 : i32
    return %c0_i32, %c0_i32_0 : i32, i32
  }
  func.func @transform_6(%arg0: i32) -> (i32, i32) {
    %c0_i32 = arith.constant 0 : i32
    %c0_i32_0 = arith.constant 0 : i32
    %c0_i32_1 = arith.constant 0 : i32
    return %c0_i32, %c0_i32_0 : i32, i32
  }
  func.func @transform_7(%arg0: i32) -> (i32, i32) {
    %c0_i32 = arith.constant 0 : i32
    %c0_i32_0 = arith.constant 0 : i32
    return %arg0, %c0_i32 : i32, i32
  }
}

</mosaic_0001>

<bundles_post_ra>
// kernel: tpu_custom_call.1
= control target key start
LH: loop header
LB: loop body
LE: loop exit
PB: predicated region body
PF: predicated region fallthrough
CT: control target
= control target key end

     0   :  { %12 = vsyncpa [#allocation3], 0  ;;  %s1781_s0 = inlined_call_operand.hbm [shape: bf16[8,640], index: 0, kind: input, shape index: {}]   ;;  %s1782_s1 = inlined_call_operand.hbm [shape: bf16[640,256], index: 1, kind: input, shape index: {}]   ;;  %s1783_s2 = inlined_call_operand.vmem [shape: f32[1,256], index: 2, kind: input, shape index: {}]   ;;  %s1784_s3 = inlined_call_operand.hbm [shape: bf16[256,256], index: 3, kind: input, shape index: {}]   ;;  %s1785_s4 = inlined_call_operand.vmem [shape: f32[1,256], index: 4, kind: input, shape index: {}]   ;;  %s1786_s5 = inlined_call_operand.hbm [shape: bf16[256,128], index: 5, kind: input, shape index: {}]   ;;  %s1787_s6 = inlined_call_operand.vmem [shape: f32[1,128], index: 6, kind: input, shape index: {}]   ;;  %s1788_s7 = inlined_call_operand.hbm [shape: f32[8,128], index: 7, kind: output, shape index: {}]  }
   0x1   :  { %13 = vsyncpa [#allocation6], 0 }
   0x2   :  { %14 = vsyncpa [#allocation9], 0 }
   0x3   :  { %15 = vsyncpa [#allocation4], 0  ;;  %s1644_s24 = smov [#allocation5]   ;;  %s1526_s28 = scalar_lea.hbm %s1782_s1, 10240 }
   0x4   :  { %s31_s25 = sshll.u32 %s1644_s24, 4  ;;  %p1527_p0 = scmp.ne.s32.totalorder %s1782_s1, %s1526_s28  ;;  %s32_s25 = int_to_ptr.vmem [resolvable:$true] %s31_s25 }
   0x5   :  { %p1530_p1 = scmp.lt.u32.totalorder %s1526_s28, %s1782_s1 }
   0x7   :  { %p1532_p2 = pnand %p1530_p1, %p1527_p0 }
   0x9   :  { %1535 = shalt.err (!%p1532_p2)
}
   0xa   :  { %s1536_s10 = scalar_lea.vmem %s32_s25, 10240  ;;  %p1541_p4 = scmp.lt.s32.totalorder %s32_s25, %s32_s25 }
   0xb   :  { %p1537_p3 = scmp.ne.s32.totalorder %s32_s25, %s1536_s10  ;;  %p1542_p5 = scmp.lt.s32.totalorder %s1536_s10, %s1536_s10 }
   0xd   :  { %p1543_p6 = por %p1542_p5, %p1541_p4 }
   0xf   :  { %p1544_p7 = pnand %p1543_p6, %p1537_p3 }
  0x11   :  { %1547 = shalt.err (!%p1544_p7)
}
  0x12   :  { %s1645_s11 = smov 128   ;;  %s1646_s12 = smov 8  }
  0x13   :  { %37 = dma.hbm_to_vmem [thread:$0]  %s1782_s1, 10240, %s32_s25, [#allocation6], %s1645_s11, %s1645_s11, %s1646_s12  }
  0x14   :  { %s1647_s15 = smov [#allocation2]   ;;  %s1648_s17 = smov [#allocation7]  }
  0x15   :  { %s22_s16 = sshll.u32 %s1647_s15, 4  ;;  %s45_s18 = sshll.u32 %s1648_s17, 4  ;;  %s23_s16 = int_to_ptr.vmem [resolvable:$true] %s22_s16  ;;  %s46_s18 = int_to_ptr.vmem [resolvable:$true] %s45_s18 }
  0x16   :  { %s1548_s21 = scalar_lea.hbm %s1781_s0, 320 }
  0x17   :  { %p1549_p8 = scmp.ne.s32.totalorder %s1781_s0, %s1548_s21  ;;  %p1552_p9 = scmp.lt.u32.totalorder %s1548_s21, %s1781_s0 }
  0x19   :  { %p1554_p10 = pnand %p1552_p9, %p1549_p8 }
  0x1b   :  { %1557 = shalt.err (!%p1554_p10)
}
  0x1c   :  { %s1558_s1 = scalar_lea.vmem %s23_s16, 320  ;;  %p1563_p12 = scmp.lt.s32.totalorder %s23_s16, %s23_s16 }
  0x1d   :  { %p1559_p11 = scmp.ne.s32.totalorder %s23_s16, %s1558_s1  ;;  %p1564_p13 = scmp.lt.s32.totalorder %s1558_s1, %s1558_s1 }
  0x1f   :  { %p1565_p0 = por %p1564_p13, %p1563_p12 }
  0x21   :  { %p1566_p1 = pnand %p1565_p0, %p1559_p11 }
  0x23   :  { %1569 = shalt.err (!%p1566_p1)
}
  0x24   :  { %25 = dma.hbm_to_vmem [thread:$0]  %s1781_s0, 320, %s23_s16, [#allocation3]  }
  0x25   :  { %s1570_s30 = scalar_lea.hbm %s1784_s3, 4096 }
  0x26   :  { %p1571_p2 = scmp.ne.s32.totalorder %s1784_s3, %s1570_s30  ;;  %p1574_p3 = scmp.lt.u32.totalorder %s1570_s30, %s1784_s3 }
  0x28   :  { %p1576_p4 = pnand %p1574_p3, %p1571_p2 }
  0x2a   :  { %1579 = shalt.err (!%p1576_p4)
}
  0x2b   :  { %s1580_s14 = scalar_lea.vmem %s46_s18, 4096  ;;  %p1585_p6 = scmp.lt.s32.totalorder %s46_s18, %s46_s18 }
  0x2c   :  { %p1581_p5 = scmp.ne.s32.totalorder %s46_s18, %s1580_s14  ;;  %p1586_p7 = scmp.lt.s32.totalorder %s1580_s14, %s1580_s14 }
  0x2e   :  { %p1587_p8 = por %p1586_p7, %p1585_p6 }
  0x30   :  { %p1588_p9 = pnand %p1587_p8, %p1581_p5 }
  0x32   :  { %1591 = shalt.err (!%p1588_p9)
}
  0x33   :  { %51 = dma.hbm_to_vmem [thread:$0]  %s1784_s3, 4096, %s46_s18, [#allocation6], %s1645_s11, %s1645_s11, %s1646_s12  }
  0x34   :  { %s1649_s16 = smov [#allocation8]   ;;  %s1592_s21 = scalar_lea.hbm %s1786_s5, 2048 }
  0x35   :  { %s59_s17 = sshll.u32 %s1649_s16, 4  ;;  %p1593_p10 = scmp.ne.s32.totalorder %s1786_s5, %s1592_s21  ;;  %s60_s17 = int_to_ptr.vmem [resolvable:$true] %s59_s17 }
  0x36   :  { %p1596_p11 = scmp.lt.u32.totalorder %s1592_s21, %s1786_s5 }
  0x38   :  { %p1598_p12 = pnand %p1596_p11, %p1593_p10 }
  0x3a   :  { %1601 = shalt.err (!%p1598_p12)
}
  0x3b   :  { %s1602_s1 = scalar_lea.vmem %s60_s17, 2048  ;;  %p1607_p0 = scmp.lt.s32.totalorder %s60_s17, %s60_s17 }
  0x3c   :  { %p1603_p13 = scmp.ne.s32.totalorder %s60_s17, %s1602_s1  ;;  %p1608_p1 = scmp.lt.s32.totalorder %s1602_s1, %s1602_s1 }
  0x3e   :  { %p1609_p2 = por %p1608_p1, %p1607_p0 }
  0x40   :  { %p1610_p3 = pnand %p1609_p2, %p1603_p13 }
  0x42   :  { %1613 = shalt.err (!%p1610_p3)
}
  0x43   :  { %s1650_s3 = smov 64   ;;  %s1651_s11 = smov 4  }
  0x44   :  { %65 = dma.hbm_to_vmem [thread:$0]  %s1786_s5, 2048, %s60_s17, [#allocation9], %s1650_s3, %s1650_s3, %s1651_s11  }
  0x45   :  { %1636 = dma.done.wait [#allocation3], 320  }
  0x46   :  { %1637 = vsyncadd [#allocation3], 4294966976 }
  0x47   :  { %1638 = dma.done.wait [#allocation6], 14336  }
  0x48   :  { %1639 = vsyncadd [#allocation6], 4294952960 }
  0x49   :  { %1640 = dma.done.wait [#allocation9], 2048  }
  0x4a   :  { %1641 = vsyncadd [#allocation9], 4294965248  ;;  %v1337_v0 = vld [vmem:[#allocation5 + $0x4] ss:$8 sps:$4 sm:$0xff]   ;;  %v1652_v1 = vmov 0   ;;  %v1752_v52 = vld [vmem:[#allocation2 + $0x8] sm:$0xff] }
  0x4b   :  { %708 = vmatprep.mubr.bf16.mxu1 %v1652_v1  ;;  %v1339_v2 = vld [vmem:[#allocation5] ss:$8 sps:$4 sm:$0xff]   ;;  %594 = vmatprep.subr.bf16.mxu0 %v1337_v0  ;;  %v1340_v3 = vld [vmem:[#allocation5 + $0x14] ss:$8 sps:$4 sm:$0xff]   ;;  %v1342_v4 = vld [vmem:[#allocation5 + $0x10] ss:$8 sps:$4 sm:$0xff]   ;;  %v1166_v57 = vcombine.high %v1752_v52, %v1752_v52 }
  0x4c   :  { %595 = vmatpush1.bf16.msra.mxu0 %v1339_v2  ;;  %v1343_v5 = vld [vmem:[#allocation5 + $0x24] ss:$8 sps:$4 sm:$0xff]   ;;  %v1345_v6 = vld [vmem:[#allocation5 + $0x20] ss:$8 sps:$4 sm:$0xff]   ;;  %v1346_v7 = vld [vmem:[#allocation5 + $0x34] ss:$8 sps:$4 sm:$0xff]  }
  0x4d   :  { %596 = vmatprep.subr.bf16.mxu0 %v1340_v3  ;;  %v1348_v8 = vld [vmem:[#allocation5 + $0x30] ss:$8 sps:$4 sm:$0xff]   ;;  %v1349_v9 = vld [vmem:[#allocation5 + $0x44] ss:$8 sps:$4 sm:$0xff]   ;;  %v1351_v10 = vld [vmem:[#allocation5 + $0x40] ss:$8 sps:$4 sm:$0xff]  }
  0x4e   :  { %v1352_v11 = vld [vmem:[#allocation5 + $0x54] ss:$8 sps:$4 sm:$0xff]   ;;  %v1354_v12 = vld [vmem:[#allocation5 + $0x50] ss:$8 sps:$4 sm:$0xff]   ;;  %v1355_v13 = vld [vmem:[#allocation5 + $0x64] ss:$8 sps:$4 sm:$0xff]  }
  0x4f   :  { %v1748_v14 = vld [vmem:[#allocation2] sm:$0xff]  ;;  %v1357_v16 = vld [vmem:[#allocation5 + $0x60] ss:$8 sps:$4 sm:$0xff]   ;;  %v1358_v17 = vld [vmem:[#allocation5 + $0x74] ss:$8 sps:$4 sm:$0xff]  }
  0x50   :  { %597 = vmatpush1.bf16.msra.mxu0 %v1342_v4  ;;  %v1164_v15 = vcombine.high %v1748_v14, %v1748_v14  ;;  %v1360_v18 = vld [vmem:[#allocation5 + $0x70] ss:$8 sps:$4 sm:$0xff]   ;;  %v1361_v19 = vld [vmem:[#allocation5 + $0x84] ss:$8 sps:$4 sm:$0xff]   ;;  %v1363_v20 = vld [vmem:[#allocation5 + $0x80] ss:$8 sps:$4 sm:$0xff]   ;;  %v1163_v54 = vcombine.low %v1748_v14, %v1748_v14 }
  0x51   :  { %598 = vmatprep.subr.bf16.mxu0 %v1343_v5  ;;  %v1364_v21 = vld [vmem:[#allocation5 + $0x94] ss:$8 sps:$4 sm:$0xff]   ;;  %v1411_v22 = vld [vmem:[#allocation5 + $0x204] ss:$8 sps:$4 sm:$0xff]   ;;  %v1366_v23 = vld [vmem:[#allocation5 + $0x90] ss:$8 sps:$4 sm:$0xff]  }
  0x52   :  { %626 = vmatprep.mubr.bf16.mxu0 %v1164_v15  ;;  %v1416_v24 = vld [vmem:[#allocation5 + $0x200] ss:$8 sps:$4 sm:$0xff]   ;;  %676 = vmatprep.subr.bf16.mxu1 %v1411_v22  ;;  %v1417_v25 = vld [vmem:[#allocation5 + $0x214] ss:$8 sps:$4 sm:$0xff]   ;;  %v1367_v26 = vld [vmem:[#allocation5 + $0xa4] ss:$8 sps:$4 sm:$0xff]  }
  0x53   :  { %677 = vmatpush1.bf16.msra.mxu1 %v1416_v24  ;;  %v1422_v27 = vld [vmem:[#allocation5 + $0x210] ss:$8 sps:$4 sm:$0xff]   ;;  %v1423_v28 = vld [vmem:[#allocation5 + $0x224] ss:$8 sps:$4 sm:$0xff]   ;;  %v1369_v29 = vld [vmem:[#allocation5 + $0xa0] ss:$8 sps:$4 sm:$0xff]  }
  0x54   :  { %599 = vmatpush1.bf16.msra.mxu0 %v1345_v6  ;;  %678 = vmatprep.subr.bf16.mxu1 %v1417_v25  ;;  %v1370_v30 = vld [vmem:[#allocation5 + $0xb4] ss:$8 sps:$4 sm:$0xff]   ;;  %v1428_v31 = vld [vmem:[#allocation5 + $0x220] ss:$8 sps:$4 sm:$0xff]   ;;  %v1372_v33 = vld [vmem:[#allocation5 + $0xb0] ss:$8 sps:$4 sm:$0xff]  }
  0x55   :  { %600 = vmatprep.subr.bf16.mxu0 %v1346_v7  ;;  %v1429_v32 = vld [vmem:[#allocation5 + $0x234] ss:$8 sps:$4 sm:$0xff]   ;;  %v1373_v34 = vld [vmem:[#allocation5 + $0xc4] ss:$8 sps:$4 sm:$0xff]   ;;  %v1434_v35 = vld [vmem:[#allocation5 + $0x230] ss:$8 sps:$4 sm:$0xff]  }
  0x56   :  { %v1435_v36 = vld [vmem:[#allocation5 + $0x244] ss:$8 sps:$4 sm:$0xff]   ;;  %v1375_v37 = vld [vmem:[#allocation5 + $0xc0] ss:$8 sps:$4 sm:$0xff]   ;;  %v1376_v38 = vld [vmem:[#allocation5 + $0xd4] ss:$8 sps:$4 sm:$0xff]  }
  0x57   :  { %679 = vmatpush1.bf16.msra.mxu1 %v1422_v27  ;;  %v1440_v39 = vld [vmem:[#allocation5 + $0x240] ss:$8 sps:$4 sm:$0xff]   ;;  %v1441_v40 = vld [vmem:[#allocation5 + $0x254] ss:$8 sps:$4 sm:$0xff]   ;;  %v1378_v41 = vld [vmem:[#allocation5 + $0xd0] ss:$8 sps:$4 sm:$0xff]  }
  0x58   :  { %601 = vmatpush1.bf16.msra.mxu0 %v1348_v8  ;;  %680 = vmatprep.subr.bf16.mxu1 %v1423_v28  ;;  %v1379_v42 = vld [vmem:[#allocation5 + $0xe4] ss:$8 sps:$4 sm:$0xff]   ;;  %v1446_v43 = vld [vmem:[#allocation5 + $0x250] ss:$8 sps:$4 sm:$0xff]   ;;  %v1381_v45 = vld [vmem:[#allocation5 + $0xe0] ss:$8 sps:$4 sm:$0xff]  }
  0x59   :  { %602 = vmatprep.subr.bf16.mxu0 %v1349_v9  ;;  %v1447_v44 = vld [vmem:[#allocation5 + $0x264] ss:$8 sps:$4 sm:$0xff]   ;;  %v1382_v46 = vld [vmem:[#allocation5 + $0xf4] ss:$8 sps:$4 sm:$0xff]   ;;  %v1452_v47 = vld [vmem:[#allocation5 + $0x260] ss:$8 sps:$4 sm:$0xff]  }
  0x5a   :  { %v1453_v48 = vld [vmem:[#allocation5 + $0x274] ss:$8 sps:$4 sm:$0xff]   ;;  %v1384_v49 = vld [vmem:[#allocation5 + $0xf0] ss:$8 sps:$4 sm:$0xff]   ;;  %v1389_v50 = vld [vmem:[#allocation5 + $0x104] ss:$8 sps:$4 sm:$0xff]  }
  0x5b   :  { %681 = vmatpush1.bf16.msra.mxu1 %v1428_v31  ;;  %v1458_v51 = vld [vmem:[#allocation5 + $0x270] ss:$8 sps:$4 sm:$0xff]   ;;  %v1464_v53 = vld [vmem:[#allocation7 + $0x4] ss:$8 sps:$4 sm:$0xff]   ;;  %v1387_v55 = vld [vmem:[#allocation5 + $0x100] ss:$8 sps:$4 sm:$0xff]  }
  0x5c   :  { %603 = vmatpush1.bf16.msra.mxu0 %v1351_v10  ;;  %682 = vmatprep.subr.bf16.mxu1 %v1429_v32  ;;  %v1392_v56 = vld [vmem:[#allocation5 + $0x114] ss:$8 sps:$4 sm:$0xff]   ;;  %v1462_v59 = vld [vmem:[#allocation7] ss:$8 sps:$4 sm:$0xff]   ;;  %v1390_v61 = vld [vmem:[#allocation5 + $0x110] ss:$8 sps:$4 sm:$0xff]  }
  0x5d   :  { %604 = vmatprep.subr.bf16.mxu0 %v1352_v11  ;;  %v1461_v58 = vld [vmem:[#allocation2 + $0x10] ss:$0 sps:$4 sm:$0xff]   ;;  %v1395_v62 = vld [vmem:[#allocation5 + $0x124] ss:$8 sps:$4 sm:$0xff]   ;;  %v1465_v63 = vld [vmem:[#allocation7 + $0x10] ss:$8 sps:$4 sm:$0xff]  }
  0x5e   :  { %v1467_v60 = vld [vmem:[#allocation7 + $0x14] ss:$8 sps:$4 sm:$0xff]   ;;  %v1393_v0 = vld [vmem:[#allocation5 + $0x120] ss:$8 sps:$4 sm:$0xff]   ;;  %v1470_v1 = vld [vmem:[#allocation7 + $0x24] ss:$8 sps:$4 sm:$0xff]  }
  0x5f   :  { %683 = vmatpush1.bf16.msra.mxu1 %v1434_v35  ;;  %v1398_v2 = vld [vmem:[#allocation5 + $0x134] ss:$8 sps:$4 sm:$0xff]   ;;  %v1468_v3 = vld [vmem:[#allocation7 + $0x20] ss:$8 sps:$4 sm:$0xff]   ;;  %v1396_v5 = vld [vmem:[#allocation5 + $0x130] ss:$8 sps:$4 sm:$0xff]  }
  0x60   :  { %605 = vmatpush1.bf16.msra.mxu0 %v1354_v12  ;;  %684 = vmatprep.subr.bf16.mxu1 %v1435_v36  ;;  %v1473_v4 = vld [vmem:[#allocation7 + $0x34] ss:$8 sps:$4 sm:$0xff]   ;;  %v1401_v6 = vld [vmem:[#allocation5 + $0x144] ss:$8 sps:$4 sm:$0xff]   ;;  %v1471_v7 = vld [vmem:[#allocation7 + $0x30] ss:$8 sps:$4 sm:$0xff]  }
  0x61   :  { %606 = vmatprep.subr.bf16.mxu0 %v1355_v13  ;;  %v1476_v8 = vld [vmem:[#allocation7 + $0x44] ss:$8 sps:$4 sm:$0xff]   ;;  %v1399_v9 = vld [vmem:[#allocation5 + $0x140] ss:$8 sps:$4 sm:$0xff]   ;;  %v1404_v10 = vld [vmem:[#allocation5 + $0x154] ss:$8 sps:$4 sm:$0xff]  }
  0x62   :  { %v1474_v11 = vld [vmem:[#allocation7 + $0x40] ss:$8 sps:$4 sm:$0xff]   ;;  %v1479_v12 = vld [vmem:[#allocation7 + $0x54] ss:$8 sps:$4 sm:$0xff]   ;;  %v1402_v13 = vld [vmem:[#allocation5 + $0x150] ss:$8 sps:$4 sm:$0xff]  }
  0x63   :  { %685 = vmatpush1.bf16.msra.mxu1 %v1440_v39  ;;  %v1407_v14 = vld [vmem:[#allocation5 + $0x164] ss:$8 sps:$4 sm:$0xff]   ;;  %v1477_v15 = vld [vmem:[#allocation7 + $0x50] ss:$8 sps:$4 sm:$0xff]   ;;  %v1413_v25 = vld [vmem:[#allocation5 + $0x180] ss:$8 sps:$4 sm:$0xff]  }
  0x64   :  { %607 = vmatpush1.bf16.msra.mxu0 %v1357_v16  ;;  %686 = vmatprep.subr.bf16.mxu1 %v1441_v40  ;;  %v1482_v16 = vld [vmem:[#allocation7 + $0x64] ss:$8 sps:$4 sm:$0xff]   ;;  %v1486_v27 = vld [vmem:[#allocation7 + $0x80] ss:$8 sps:$4 sm:$0xff]   ;;  %v1491_v28 = vld [vmem:[#allocation7 + $0x94] ss:$8 sps:$4 sm:$0xff]  }
  0x65   :  { %608 = vmatprep.subr.bf16.mxu0 %v1358_v17  ;;  %v1405_v17 = vld [vmem:[#allocation5 + $0x160] ss:$8 sps:$4 sm:$0xff]   ;;  %v1415_v22 = vld [vmem:[#allocation5 + $0x184] ss:$8 sps:$4 sm:$0xff]   ;;  %v1489_v31 = vld [vmem:[#allocation7 + $0x90] ss:$8 sps:$4 sm:$0xff]  }
  0x66   :  { %v1488_v24 = vld [vmem:[#allocation7 + $0x84] ss:$8 sps:$4 sm:$0xff]   ;;  %v1492_v35 = vld [vmem:[#allocation7 + $0xa0] ss:$8 sps:$4 sm:$0xff]   ;;  %v1497_v36 = vld [vmem:[#allocation7 + $0xb4] ss:$8 sps:$4 sm:$0xff]  }
  0x67   :  { %687 = vmatpush1.bf16.msra.mxu1 %v1446_v43  ;;  %v1494_v32 = vld [vmem:[#allocation7 + $0xa4] ss:$8 sps:$4 sm:$0xff]   ;;  %v1495_v39 = vld [vmem:[#allocation7 + $0xb0] ss:$8 sps:$4 sm:$0xff]   ;;  %v1498_v43 = vld [vmem:[#allocation7 + $0xc0] ss:$8 sps:$4 sm:$0xff]  }
  0x68   :  { %609 = vmatpush1.bf16.msra.mxu0 %v1360_v18  ;;  %688 = vmatprep.subr.bf16.mxu1 %v1447_v44  ;;  %v1410_v18 = vld [vmem:[#allocation5 + $0x174] ss:$8 sps:$4 sm:$0xff]   ;;  %v1500_v40 = vld [vmem:[#allocation7 + $0xc4] ss:$8 sps:$4 sm:$0xff]   ;;  %v1443_v44 = vld [vmem:[#allocation5 + $0x1d0] ss:$8 sps:$4 sm:$0xff]  }
  0x69   :  { %610 = vmatprep.subr.bf16.mxu0 %v1361_v19  ;;  %v1480_v19 = vld [vmem:[#allocation7 + $0x60] ss:$8 sps:$4 sm:$0xff]  }
  0x6b   :  { %689 = vmatpush1.bf16.msra.mxu1 %v1452_v47  ;;  %v1457_v47 = vld [vmem:[#allocation5 + $0x1f4] ss:$8 sps:$4 sm:$0xff]  }
  0x6c   :  { %611 = vmatpush1.bf16.msra.mxu0 %v1363_v20  ;;  %690 = vmatprep.subr.bf16.mxu1 %v1453_v48  ;;  %v1485_v20 = vld [vmem:[#allocation7 + $0x74] ss:$8 sps:$4 sm:$0xff]   ;;  %v1455_v48 = vld [vmem:[#allocation5 + $0x1f0] ss:$8 sps:$4 sm:$0xff]  }
  0x6d   :  { %612 = vmatprep.subr.bf16.mxu0 %v1364_v21  ;;  %v1408_v21 = vld [vmem:[#allocation5 + $0x170] ss:$8 sps:$4 sm:$0xff]  }
  0x6f   :  { %691 = vmatpush1.bf16.msra.mxu1 %v1458_v51  ;;  %v1503_v51 = vld [vmem:[#allocation7 + $0xd4] ss:$8 sps:$4 sm:$0xff]  }
  0x70   :  { %613 = vmatpush1.bf16.msra.mxu0 %v1366_v23  ;;  %925 = vmatprep.subr.bf16.mxu1 %v1464_v53  ;;  %v1483_v23 = vld [vmem:[#allocation7 + $0x70] ss:$8 sps:$4 sm:$0xff]   ;;  %v1506_v53 = vld [vmem:[#allocation7 + $0xe4] ss:$8 sps:$4 sm:$0xff]  }
  0x71   :  { %614 = vmatprep.subr.bf16.mxu0 %v1367_v26  ;;  %v1421_v26 = vld [vmem:[#allocation5 + $0x194] ss:$8 sps:$4 sm:$0xff]  }
  0x72   :  { %709 = vmatmul.mubr.bf16.vlgmr.msra.gmra.mrb[0].mxu1 %v1461_v58 }
  0x73   :  { %926 = vmatpush1.bf16.msra.mxu1 %v1462_v59 }
  0x74   :  { %615 = vmatpush1.bf16.msra.mxu0 %v1369_v29  ;;  %927 = vmatprep.subr.bf16.mxu1 %v1467_v60  ;;  %v1419_v29 = vld [vmem:[#allocation5 + $0x190] ss:$8 sps:$4 sm:$0xff]  }
  0x75   :  { %616 = vmatprep.subr.bf16.mxu0 %v1370_v30  ;;  %v1427_v30 = vld [vmem:[#allocation5 + $0x1a4] ss:$8 sps:$4 sm:$0xff]  }
  0x77   :  { %928 = vmatpush1.bf16.msra.mxu1 %v1465_v63 }
  0x78   :  { %617 = vmatpush1.bf16.msra.mxu0 %v1372_v33  ;;  %929 = vmatprep.subr.bf16.mxu1 %v1470_v1  ;;  %v1425_v33 = vld [vmem:[#allocation5 + $0x1a0] ss:$8 sps:$4 sm:$0xff]  }
  0x79   :  { %618 = vmatprep.subr.bf16.mxu0 %v1373_v34  ;;  %v1433_v34 = vld [vmem:[#allocation5 + $0x1b4] ss:$8 sps:$4 sm:$0xff]  }
  0x7b   :  { %930 = vmatpush1.bf16.msra.mxu1 %v1468_v3 }
  0x7c   :  { %619 = vmatpush1.bf16.msra.mxu0 %v1375_v37  ;;  %931 = vmatprep.subr.bf16.mxu1 %v1473_v4  ;;  %v1431_v37 = vld [vmem:[#allocation5 + $0x1b0] ss:$8 sps:$4 sm:$0xff]  }
  0x7d   :  { %620 = vmatprep.subr.bf16.mxu0 %v1376_v38  ;;  %v1439_v38 = vld [vmem:[#allocation5 + $0x1c4] ss:$8 sps:$4 sm:$0xff]  }
  0x7f   :  { %932 = vmatpush1.bf16.msra.mxu1 %v1471_v7 }
  0x80   :  { %621 = vmatpush1.bf16.msra.mxu0 %v1378_v41  ;;  %933 = vmatprep.subr.bf16.mxu1 %v1476_v8  ;;  %v1437_v41 = vld [vmem:[#allocation5 + $0x1c0] ss:$8 sps:$4 sm:$0xff]  }
  0x81   :  { %622 = vmatprep.subr.bf16.mxu0 %v1379_v42  ;;  %v1445_v42 = vld [vmem:[#allocation5 + $0x1d4] ss:$8 sps:$4 sm:$0xff]  }
  0x83   :  { %934 = vmatpush1.bf16.msra.mxu1 %v1474_v11 }
  0x84   :  { %623 = vmatpush1.bf16.msra.mxu0 %v1381_v45  ;;  %935 = vmatprep.subr.bf16.mxu1 %v1479_v12  ;;  %v1451_v45 = vld [vmem:[#allocation5 + $0x1e4] ss:$8 sps:$4 sm:$0xff]  }
  0x85   :  { %624 = vmatprep.subr.bf16.mxu0 %v1382_v46  ;;  %v1449_v46 = vld [vmem:[#allocation5 + $0x1e0] ss:$8 sps:$4 sm:$0xff]  }
  0x87   :  { %936 = vmatpush1.bf16.msra.mxu1 %v1477_v15  ;;  %v1511_v15 = vld [vmem:[#allocation8] sm:$0xff]  }
  0x88   :  { %625 = vmatpush1.bf16.msra.mxu0 %v1384_v49  ;;  %937 = vmatprep.subr.bf16.mxu1 %v1482_v16  ;;  %v1165_v49 = vcombine.low %v1752_v52, %v1752_v52 }
  0x89   :  { %635 = vmatprep.subr.bf16.mxu0 %v1389_v50  ;;  %v1501_v50 = vld [vmem:[#allocation7 + $0xd0] ss:$8 sps:$4 sm:$0xff]  }
  0x8b   :  { %627 = vmatmul.mubr.bf16.vlgmr.msra.gmra.mrb[0].mxu0 %v1163_v54  ;;  %938 = vmatpush1.bf16.msra.mxu1 %v1480_v19  ;;  %v1504_v54 = vld [vmem:[#allocation7 + $0xe0] ss:$8 sps:$4 sm:$0xff]   ;;  %v1514_v19 = vld [vmem:[#allocation8 + $0x50] sm:$0xff]  }
  0x8c   :  { %636 = vmatpush1.bf16.msra.mxu0 %v1387_v55  ;;  %667 = vmatprep.mubr.bf16.mxu0 %v1166_v57  ;;  %v1509_v55 = vld [vmem:[#allocation7 + $0xf4] ss:$8 sps:$4 sm:$0xff]   ;;  %v1510_v57 = vld [vmem:[#allocation8 + $0x40] sm:$0xff]  }
  0x8d   :  { %637 = vmatprep.subr.bf16.mxu0 %v1392_v56  ;;  %939 = vmatprep.subr.bf16.mxu1 %v1485_v20  ;;  %v1507_v56 = vld [vmem:[#allocation7 + $0xf0] ss:$8 sps:$4 sm:$0xff]  }
  0x8e   :  { %v1515_v20 = vld [vmem:[#allocation8 + $0x10] sm:$0xff]  }
  0x8f   :  { %940 = vmatpush1.bf16.msra.mxu1 %v1483_v23  ;;  %v1518_v23 = vld [vmem:[#allocation8 + $0x60] sm:$0xff]  }
  0x90   :  { %638 = vmatpush1.bf16.msra.mxu0 %v1390_v61  ;;  %941 = vmatprep.subr.bf16.mxu1 %v1488_v24  ;;  %v166_v61 = vlaneseq  ;;  %v1519_v24 = vld [vmem:[#allocation8 + $0x20] sm:$0xff]  }
  0x91   :  { %639 = vmatprep.subr.bf16.mxu0 %v1395_v62 }
  0x92   :  { %v167_v62 = vshrl.u32 %v166_v61, 7 }
  0x93   :  { %942 = vmatpush1.bf16.msra.mxu1 %v1486_v27  ;;  %v1522_v27 = vld [vmem:[#allocation8 + $0x70] sm:$0xff]  }
  0x94   :  { %640 = vmatpush1.bf16.msra.mxu0 %v1393_v0  ;;  %943 = vmatprep.subr.bf16.mxu1 %v1491_v28  ;;  %v168_v63 = vsub.s32 0, %v167_v62  ;;  %v164_v0 = vld [vmem:[%s1783_s2] sm:$0x3]  ;;  %v172_v1 = vsub.s32 1, %v167_v62  ;;  %v1523_v28 = vld [vmem:[#allocation8 + $0x30] sm:$0xff]  }
  0x95   :  { %641 = vmatprep.subr.bf16.mxu0 %v1398_v2 }
  0x96   :  { %v169_v2 = vrot.slane %v164_v0, %v168_v63  ;;  %v173_v3 = vrot.slane %v164_v0, %v172_v1 }
  0x97   :  { %944 = vmatpush1.bf16.msra.mxu1 %v1489_v31  ;;  %v753_v31 = vld [vmem:[%s1785_s4] sm:$0x3]  ;;  %s1653_s4 = smov [#allocation10]  }
  0x98   :  { %642 = vmatpush1.bf16.msra.mxu0 %v1396_v5  ;;  %945 = vmatprep.subr.bf16.mxu1 %v1494_v32  ;;  %v758_v32 = vrot.slane %v753_v31, %v168_v63  ;;  %s1152_s30 = sshll.u32 %s1653_s4, 4  ;;  %s1153_s30 = int_to_ptr.vmem [resolvable:$true] %s1152_s30 }
  0x99   :  { %643 = vmatprep.subr.bf16.mxu0 %v1401_v6  ;;  %s1614_s8 = scalar_lea.vmem %s1153_s30, 128  ;;  %p1619_p5 = scmp.lt.s32.totalorder %s1153_s30, %s1153_s30 }
  0x9a   :  { %p1615_p4 = scmp.ne.s32.totalorder %s1153_s30, %s1614_s8  ;;  %p1620_p6 = scmp.lt.s32.totalorder %s1614_s8, %s1614_s8 }
  0x9b   :  { %946 = vmatpush1.bf16.msra.mxu1 %v1492_v35 }
  0x9c   :  { %644 = vmatpush1.bf16.msra.mxu0 %v1399_v9  ;;  %947 = vmatprep.subr.bf16.mxu1 %v1497_v36  ;;  %p1621_p7 = por %p1620_p6, %p1619_p5 }
  0x9d   :  { %645 = vmatprep.subr.bf16.mxu0 %v1404_v10 }
  0x9e   :  { %p1622_p8 = pnand %p1621_p7, %p1615_p4 }
  0x9f   :  { %948 = vmatpush1.bf16.msra.mxu1 %v1495_v39 }
  0xa0   :  { %646 = vmatpush1.bf16.msra.mxu0 %v1402_v13  ;;  %949 = vmatprep.subr.bf16.mxu1 %v1500_v40 }
  0xa1   :  { %647 = vmatprep.subr.bf16.mxu0 %v1407_v14 }
  0xa3   :  { %950 = vmatpush1.bf16.msra.mxu1 %v1498_v43 }
  0xa4   :  { %648 = vmatpush1.bf16.msra.mxu0 %v1405_v17  ;;  %951 = vmatprep.subr.bf16.mxu1 %v1503_v51  ;;  %v1512_v17 = vld [vmem:[#allocation8 + $0x48] sm:$0xff]  }
  0xa5   :  { %649 = vmatprep.subr.bf16.mxu0 %v1410_v18  ;;  %v1513_v18 = vld [vmem:[#allocation8 + $0x8] sm:$0xff]  }
  0xa7   :  { %952 = vmatpush1.bf16.msra.mxu1 %v1501_v50 }
  0xa8   :  { %650 = vmatpush1.bf16.msra.mxu0 %v1408_v21  ;;  %953 = vmatprep.subr.bf16.mxu1 %v1506_v53  ;;  %v1516_v21 = vld [vmem:[#allocation8 + $0x58] sm:$0xff]  }
  0xa9   :  { %651 = vmatprep.subr.bf16.mxu0 %v1415_v22  ;;  %v1517_v22 = vld [vmem:[#allocation8 + $0x18] sm:$0xff]  }
  0xab   :  { %954 = vmatpush1.bf16.msra.mxu1 %v1504_v54 }
  0xac   :  { %652 = vmatpush1.bf16.msra.mxu0 %v1413_v25  ;;  %955 = vmatprep.subr.bf16.mxu1 %v1509_v55  ;;  %v1520_v25 = vld [vmem:[#allocation8 + $0x68] sm:$0xff]  }
  0xad   :  { %653 = vmatprep.subr.bf16.mxu0 %v1421_v26  ;;  %v1521_v26 = vld [vmem:[#allocation8 + $0x28] sm:$0xff]  }
  0xaf   :  { %956 = vmatpush1.bf16.msra.mxu1 %v1507_v56 }
  0xb0   :  { %654 = vmatpush1.bf16.msra.mxu0 %v1419_v29  ;;  %1297 = vmatprep.subr.bf16.mxu1 %v1510_v57  ;;  %v1524_v29 = vld [vmem:[#allocation8 + $0x78] sm:$0xff]  }
  0xb1   :  { %655 = vmatprep.subr.bf16.mxu0 %v1427_v30  ;;  %v1525_v30 = vld [vmem:[#allocation8 + $0x38] sm:$0xff]  }
  0xb4   :  { %656 = vmatpush1.bf16.msra.mxu0 %v1425_v33  ;;  %v762_v33 = vrot.slane %v753_v31, %v172_v1 }
  0xb5   :  { %657 = vmatprep.subr.bf16.mxu0 %v1433_v34 }
  0xb8   :  { %658 = vmatpush1.bf16.msra.mxu0 %v1431_v37 }
  0xb9   :  { %659 = vmatprep.subr.bf16.mxu0 %v1439_v38 }
  0xbc   :  { %660 = vmatpush1.bf16.msra.mxu0 %v1437_v41 }
  0xbd   :  { %661 = vmatprep.subr.bf16.mxu0 %v1445_v42 }
  0xc0   :  { %662 = vmatpush1.bf16.msra.mxu0 %v1443_v44 }
  0xc1   :  { %663 = vmatprep.subr.bf16.mxu0 %v1451_v45  ;;  %v1280_v45 = vld [vmem:[%s1787_s6] ss:$0 sm:$0xff] }
  0xc4   :  { %664 = vmatpush1.bf16.msra.mxu0 %v1449_v46 }
  0xc5   :  { %665 = vmatprep.subr.bf16.mxu0 %v1457_v47 }
  0xc8   :  { %666 = vmatpush1.bf16.msra.mxu0 %v1455_v48 }
  0xcb   :  { %668 = vmatmul.mubr.bf16.vlgmr.msra.gmra.mrb[0].mxu0 %v1165_v49 }
 0x145   :  { %v710_v58 = vpop.f32.mrb[0].mxu1 }
 0x146   :  { %v712_v59 = vpop.f32.mrb[1].mxu1 }
 0x147   :  { %v714_v60 = vpop.f32.mrb[2].mxu1 }
 0x148   :  { %v715_v52 = vpop.f32.mrb[3].mxu1 }
 0x19e   :  { %v669_v4 = vpop.f32.mrb[0].mxu0 }
 0x19f   :  { %v1319_v5 = vadd.f32 %v669_v4, %v169_v2  ;;  %v671_v6 = vpop.f32.mrb[1].mxu0 }
 0x1a0   :  { %v1321_v7 = vadd.f32 %v671_v6, %v173_v3  ;;  %v673_v8 = vpop.f32.mrb[2].mxu0 }
 0x1a1   :  { %v1320_v9 = vadd.f32 %v1319_v5, %v710_v58  ;;  %v674_v10 = vpop.f32.mrb[3].mxu0 }
 0x1a2   :  { %v1322_v11 = vadd.f32 %v1321_v7, %v712_v59 }
 0x1a3   :  { %v717_v12 = vmax.f32 %v1320_v9, 0.0 }
 0x1a4   :  { %v718_v13 = vmax.f32 %v1322_v11, 0.0 }
 0x1a5   :  { %v719_v16 = vpack.c.bf16 %v717_v12, %v717_v12 }
 0x1a6   :  { %v720_v14 = vpack.c.bf16 %v718_v13, %v718_v13 }
 0x1a8   :  { %957 = vmatprep.mubr.bf16.mxu1 %v720_v14 }
 0x1a9   :  { %958 = vmatmul.mubr.bf16.vlgmr.msra.gmra.mrb[4].mxu1 %v719_v16 }
 0x1aa   :  { %1298 = vmatpush3.bf16.msra.mxu1 %v1511_v15 }
 0x1ab   :  { %1299 = vmatprep.subr.bf16.mxu1 %v1512_v17 }
 0x1ae   :  { %1300 = vmatpush3.bf16.msra.mxu1 %v1513_v18 }
 0x1af   :  { %1301 = vmatprep.subr.bf16.mxu1 %v1514_v19 }
 0x1b2   :  { %1302 = vmatpush3.bf16.msra.mxu1 %v1515_v20 }
 0x1b3   :  { %1303 = vmatprep.subr.bf16.mxu1 %v1516_v21 }
 0x1b6   :  { %1304 = vmatpush3.bf16.msra.mxu1 %v1517_v22 }
 0x1b7   :  { %1305 = vmatprep.subr.bf16.mxu1 %v1518_v23 }
 0x1ba   :  { %1306 = vmatpush3.bf16.msra.mxu1 %v1519_v24 }
 0x1bb   :  { %1307 = vmatprep.subr.bf16.mxu1 %v1520_v25 }
 0x1be   :  { %1308 = vmatpush3.bf16.msra.mxu1 %v1521_v26 }
 0x1bf   :  { %1309 = vmatprep.subr.bf16.mxu1 %v1522_v27 }
 0x1c2   :  { %1310 = vmatpush3.bf16.msra.mxu1 %v1523_v28 }
 0x1c3   :  { %1311 = vmatprep.subr.bf16.mxu1 %v1524_v29 }
 0x1c6   :  { %1312 = vmatpush3.bf16.msra.mxu1 %v1525_v30 }
 0x27c   :  { %v959_v34 = vpop.f32.mrb[4].mxu1 }
 0x27d   :  { %v960_v35 = vadd.f32 %v959_v34, %v758_v32  ;;  %v961_v36 = vpop.f32.mrb[5].mxu1 }
 0x27e   :  { %v962_v37 = vadd.f32 %v961_v36, %v762_v33  ;;  %v963_v38 = vpop.f32.mrb[6].mxu1 }
 0x27f   :  { %v966_v39 = vmax.f32 %v960_v35, 0.0  ;;  %v964_v40 = vpop.f32.mrb[7].mxu1 }
 0x280   :  { %v967_v41 = vmax.f32 %v962_v37, 0.0 }
 0x281   :  { %v968_v43 = vpack.c.bf16 %v966_v39, %v966_v39 }
 0x282   :  { %v969_v42 = vpack.c.bf16 %v967_v41, %v967_v41 }
 0x284   :  { %1137 = vmatprep.mubr.bf16.mxu1 %v969_v42 }
 0x285   :  { %1138 = vmatmul.mubr.bf16.vlgmr.msra.gmra.mrb[8].mxu1 %v968_v43 }
 0x358   :  { %v1313_v44 = vpop.f32.mrb[8].mxu1 }
 0x359   :  { %v1314_v46 = vpop.f32.mrb[9].mxu1 }
 0x35a   :  { %v1315_v47 = vadd.f32 %v1314_v46, %v1313_v44  ;;  %v1316_v48 = vpop.f32.mrb[10].mxu1 }
 0x35b   :  { %v1317_v49 = vpop.f32.mrb[11].mxu1 }
 0x35c   :  { %v1140_v50 = vadd.f32 %v1315_v47, %v1280_v45 }
 0x35e   :  { %1145 = vst [vmem:[#allocation10] sm:$0xff] %v1140_v50 }
 0x35f   :  { %1625 = shalt.err (!%p1622_p8)
}
 0x360   :  { %s1626_s6 = scalar_lea.hbm %s1788_s7, 128 }
 0x361   :  { %p1627_p9 = scmp.ne.s32.totalorder %s1788_s7, %s1626_s6  ;;  %p1630_p10 = scmp.lt.u32.totalorder %s1626_s6, %s1788_s7 }
 0x363   :  { %p1632_p11 = pnand %p1630_p10, %p1627_p9 }
 0x365   :  { %1635 = shalt.err (!%p1632_p11)
}
 0x366   :  { %1155 = dma.vmem_to_hbm [thread:$0]  %s1153_s30, 128, %s1788_s7, [#allocation4]  }
 0x367   :  { %1642 = dma.done.wait [#allocation4], 128  }
 0x368   :  { %1643 = vsyncadd [#allocation4], 4294967168 }
 0x369   :  { %1159 = vsyncpa [#allocation3], 1 }
 0x36a   :  { %1160 = vsyncpa [#allocation6], 1 }
 0x36b   :  { %1161 = vsyncpa [#allocation9], 1 }
 0x36c   :  { %1162 = vsyncpa [#allocation4], 1 }

</bundles_post_ra>
